<compile_context>
chip_gen: v6e
topology: v6e:2x2x1
jax: 0.10.0
libtpu: 0.0.40
codegen_flags: <defaults>
</compile_context>

<pallas_src>
import functools

import jax
import jax.numpy as jnp
from jax.experimental import pallas as pl
from jax.experimental.pallas import tpu as pltpu

# ----- small BERT config (bert-base-cased layout, shrunk for the demo) -----
VOCAB = 100
HIDDEN = 32
HEADS = 4
HEAD_DIM = HIDDEN // HEADS
INTERMEDIATE = 64
LAYERS = 2
MAX_POS = 16
TYPE_VOCAB = 2
LN_EPS = 1e-12
BATCH = 2
SEQ = 8


# ------------------------- in-kernel helpers (kept in f32) -------------------------
def _layernorm(x, g, b, eps):
    mean = jnp.mean(x, axis=-1, keepdims=True)
    xc = x - mean
    var = jnp.mean(xc * xc, axis=-1, keepdims=True)
    return xc * jax.lax.rsqrt(var + eps) * g + b


def _erf(x):
    # Abramowitz & Stegun 7.1.26 (|err| < 1.5e-7): gives exact-GELU semantics
    # (HF 'gelu' uses erf) using only EUP exp + VPU ops, since lax.erf has no
    # guaranteed Mosaic lowering.
    ax = jnp.abs(x)
    t = 1.0 / (1.0 + 0.3275911 * ax)
    poly = ((((1.061405429 * t - 1.453152027) * t + 1.421413741) * t
             - 0.284496736) * t + 0.254829592) * t
    y = 1.0 - poly * jnp.exp(-ax * ax)
    return jnp.where(x >= 0.0, y, -y)


def _gelu_exact(x):
    return 0.5 * x * (1.0 + _erf(x * 0.7071067811865476))


# ---------------------------- Pallas kernels ----------------------------
def layernorm_kernel(x_ref, g_ref, b_ref, o_ref, *, eps):
    # No zero-residual stream: pure LN on the (pre-summed) embeddings.
    o_ref[...] = _layernorm(x_ref[...], g_ref[...], b_ref[...], eps).astype(o_ref.dtype)


def layernorm(x, gamma, beta, block_rows, eps=LN_EPS):
    M, D = x.shape
    return pl.pallas_call(
        functools.partial(layernorm_kernel, eps=eps),
        out_shape=jax.ShapeDtypeStruct((M, D), jnp.float32),
        grid=(M // block_rows,),
        in_specs=[
            pl.BlockSpec((block_rows, D), lambda i: (i, 0)),
            pl.BlockSpec((1, D), lambda i: (0, 0)),
            pl.BlockSpec((1, D), lambda i: (0, 0)),
        ],
        out_specs=pl.BlockSpec((block_rows, D), lambda i: (i, 0)),
        compiler_params=pltpu.CompilerParams(dimension_semantics=("parallel",)),
    )(x, gamma.reshape(1, D), beta.reshape(1, D))


def encoder_layer_kernel(x_ref, mask_ref, wqkv_ref, bqkv_ref, wo_ref, bo_ref,
                         ln1g_ref, ln1b_ref, wi_ref, bi_ref, wo2_ref, bo2_ref,
                         ln2g_ref, ln2b_ref, o_ref, *, heads, head_dim, scale, eps):
    d = heads * head_dim
    x = x_ref[...]                       # (S, D) f32 rows of one batch element
    mask = mask_ref[0]                   # (S, S) additive mask (0 / -10000)
    x16 = x.astype(jnp.bfloat16)

    # --- fused QKV projection: one MXU pass with N = 3D (bf16 ops, f32 acc) ---
    qkv = jnp.dot(x16, wqkv_ref[...], preferred_element_type=jnp.float32)
    qkv = qkv + bqkv_ref[...]
    q = qkv[:, 0 * d:1 * d]
    k = qkv[:, 1 * d:2 * d]
    v = qkv[:, 2 * d:3 * d]

    # --- attention: all heads in one body; output projection Wo folded into the
    #     head loop (ctx @ Wo == sum_h ctx_h @ Wo[h*dh:(h+1)*dh]) -> no concat,
    #     no transposes, no HBM round trips.
    wo = wo_ref[...]
    attn = jnp.zeros(x.shape, jnp.float32)
    for h in range(heads):
        sl = slice(h * head_dim, (h + 1) * head_dim)
        qh = q[:, sl].astype(jnp.bfloat16)
        kh = k[:, sl].astype(jnp.bfloat16)
        vh = v[:, sl].astype(jnp.bfloat16)
        s = jax.lax.dot_general(qh, kh, (((1,), (1,)), ((), ())),
                                preferred_element_type=jnp.float32)   # (S, S)
        s = s * scale + mask
        s_max = jnp.max(s, axis=-1, keepdims=True)
        p = jnp.exp(s - s_max)
        p = p * pl.reciprocal(jnp.sum(p, axis=-1, keepdims=True), approx=True)
        ctx = jnp.dot(p.astype(jnp.bfloat16), vh,
                      preferred_element_type=jnp.float32)             # (S, dh)
        attn = attn + jnp.dot(ctx.astype(jnp.bfloat16), wo[sl, :],
                              preferred_element_type=jnp.float32)
    attn = attn + bo_ref[...]

    # --- add & LayerNorm 1 (f32) ---
    h1 = _layernorm(attn + x, ln1g_ref[...], ln1b_ref[...], eps)

    # --- FFN: exact-GELU(h1 @ Wi + bi) @ Wo2 + bo2 ---
    inter = jnp.dot(h1.astype(jnp.bfloat16), wi_ref[...],
                    preferred_element_type=jnp.float32) + bi_ref[...]
    inter = _gelu_exact(inter)
    ffn = jnp.dot(inter.astype(jnp.bfloat16), wo2_ref[...],
                  preferred_element_type=jnp.float32) + bo2_ref[...]

    # --- add & LayerNorm 2 (f32) ---
    o_ref[...] = _layernorm(ffn + h1, ln2g_ref[...], ln2b_ref[...], eps).astype(o_ref.dtype)


def encoder_layer(h, mask3, lp, *, batch, seq):
    d = HIDDEN
    kernel = functools.partial(
        encoder_layer_kernel, heads=HEADS, head_dim=HEAD_DIM,
        scale=1.0 / (HEAD_DIM ** 0.5), eps=LN_EPS)

    row_spec = pl.BlockSpec((seq, d), lambda b: (b, 0))

    def rep(shape):
        # weight/bias blocks: constant block index -> fetched once, kept resident
        return pl.BlockSpec(shape, lambda b, _n=len(shape): (0,) * _n)

    w16 = jnp.bfloat16
    return pl.pallas_call(
        kernel,
        out_shape=jax.ShapeDtypeStruct((batch * seq, d), jnp.float32),
        grid=(batch,),
        in_specs=[
            row_spec,                                          # x rows of batch b
            pl.BlockSpec((1, seq, seq), lambda b: (b, 0, 0)),  # additive mask
            rep((d, 3 * d)),         # wqkv (bf16)
            rep((1, 3 * d)),         # bqkv
            rep((d, d)),             # wo   (bf16)
            rep((1, d)),             # bo
            rep((1, d)),             # ln1 gamma
            rep((1, d)),             # ln1 beta
            rep((d, INTERMEDIATE)),  # wi   (bf16)
            rep((1, INTERMEDIATE)),  # bi
            rep((INTERMEDIATE, d)),  # wo2  (bf16)
            rep((1, d)),             # bo2
            rep((1, d)),             # ln2 gamma
            rep((1, d)),             # ln2 beta
        ],
        out_specs=row_spec,
        compiler_params=pltpu.CompilerParams(
            dimension_semantics=("parallel",)),                # 2 TCs on v7x
    )(h, mask3,
      lp["wqkv"].astype(w16), lp["bqkv"].reshape(1, 3 * d),
      lp["wo"].astype(w16), lp["bo"].reshape(1, d),
      lp["ln1_g"].reshape(1, d), lp["ln1_b"].reshape(1, d),
      lp["wi"].astype(w16), lp["bi"].reshape(1, INTERMEDIATE),
      lp["wo2"].astype(w16), lp["bo2"].reshape(1, d),
      lp["ln2_g"].reshape(1, d), lp["ln2_b"].reshape(1, d))


# ---------------------------- parameters ----------------------------
def init_params(key):
    def normal(k, shape):
        return (0.02 * jax.random.normal(k, shape)).astype(jnp.float32)

    keys = iter(jax.random.split(key, 8 + LAYERS * 8))
    params = {
        "word_emb": normal(next(keys), (VOCAB, HIDDEN)),
        "pos_emb": normal(next(keys), (MAX_POS, HIDDEN)),
        "type_emb": normal(next(keys), (TYPE_VOCAB, HIDDEN)),
        "emb_ln_g": jnp.ones((HIDDEN,), jnp.float32),
        "emb_ln_b": jnp.zeros((HIDDEN,), jnp.float32),
        "layers": [],
    }
    for _ in range(LAYERS):
        lp = {
            "wqkv": normal(next(keys), (HIDDEN, 3 * HIDDEN)),   # fused [Wq|Wk|Wv]
            "bqkv": jnp.zeros((3 * HIDDEN,), jnp.float32),
            "wo": normal(next(keys), (HIDDEN, HIDDEN)),
            "bo": jnp.zeros((HIDDEN,), jnp.float32),
            "ln1_g": jnp.ones((HIDDEN,), jnp.float32),
            "ln1_b": jnp.zeros((HIDDEN,), jnp.float32),
            "wi": normal(next(keys), (HIDDEN, INTERMEDIATE)),
            "bi": jnp.zeros((INTERMEDIATE,), jnp.float32),
            "wo2": normal(next(keys), (INTERMEDIATE, HIDDEN)),
            "bo2": jnp.zeros((HIDDEN,), jnp.float32),
            "ln2_g": jnp.ones((HIDDEN,), jnp.float32),
            "ln2_b": jnp.zeros((HIDDEN,), jnp.float32),
        }
        params["layers"].append(lp)
    return params


# ---------------------------- forward pass ----------------------------
def bert_forward(params, input_ids, attention_mask):
    B, S = input_ids.shape
    D = HIDDEN

    # --- embeddings: gathers are glue (plain JAX); LN in Pallas, no zero residual ---
    we = params["word_emb"][input_ids]                    # (B, S, D)
    pe = params["pos_emb"][:S][None, :, :]                # (1, S, D)
    te = params["type_emb"][0][None, None, :]             # token_type_ids == 0
    emb = (we + pe + te).astype(jnp.float32).reshape(B * S, D)
    h = layernorm(emb, params["emb_ln_g"], params["emb_ln_b"], block_rows=S)

    # HF-style additive extended attention mask, pre-broadcast to (B, S, S)
    neg = (1.0 - attention_mask.astype(jnp.float32)) * -10000.0   # (B, S)
    mask3 = jnp.broadcast_to(neg[:, None, :], (B, S, S))

    # one fused pallas_call per encoder layer (vs ~14 before)
    for lp in params["layers"]:
        h = encoder_layer(h, mask3, lp, batch=B, seq=S)

    last_hidden = h.reshape(B, S, D)
    return last_hidden[:, 0, :]                            # CLS token, as in Bert.forward


if __name__ == "__main__":
    key = jax.random.PRNGKey(0)
    pkey, ikey = jax.random.split(key)
    params = init_params(pkey)

    input_ids = jax.random.randint(ikey, (BATCH, SEQ), 0, VOCAB, dtype=jnp.int32)
    attention_mask = jnp.ones((BATCH, SEQ), jnp.int32).at[1, SEQ - 2:].set(0)

    out = bert_forward(params, input_ids, attention_mask)
    jax.block_until_ready(out)
    assert out.shape == (BATCH, HIDDEN) and out.dtype == jnp.float32
    print("KERNEL_OK")
</pallas_src>

<mosaic_0001>
module attributes {stable_mosaic.version = 11 : i64} {
  func.func @layernorm_kernel(%arg0: i32, %arg1: memref<8x32xf32, #tpu.memory_space<vmem>>, %arg2: memref<1x32xf32, #tpu.memory_space<vmem>>, %arg3: memref<1x32xf32, #tpu.memory_space<vmem>>, %arg4: memref<8x32xf32, #tpu.memory_space<vmem>>) attributes {dimension_semantics = [#tpu.dimension_semantics<parallel>], iteration_bounds = array<i64: 2>, scalar_prefetch = 0 : i64, scratch_operands = 0 : i64, tpu.core_type = #tpu.core_type<tc>, window_params = [{transform_indices = @transform_0, window_bounds = array<i64: 8, 32>}, {pipeline_mode = #tpu.pipeline_mode<synchronous>, transform_indices = @transform_1, window_bounds = array<i64: 1, 32>}, {pipeline_mode = #tpu.pipeline_mode<synchronous>, transform_indices = @transform_2, window_bounds = array<i64: 1, 32>}, {transform_indices = @transform_3, window_bounds = array<i64: 8, 32>}]} {
    %c0 = arith.constant 0 : index
    %c0_0 = arith.constant 0 : index
    %0 = vector.load %arg1[%c0, %c0_0] : memref<8x32xf32, #tpu.memory_space<vmem>>, vector<8x32xf32>
    %c0_1 = arith.constant 0 : index
    %c0_2 = arith.constant 0 : index
    %1 = vector.load %arg2[%c0_1, %c0_2] : memref<1x32xf32, #tpu.memory_space<vmem>>, vector<1x32xf32>
    %c0_3 = arith.constant 0 : index
    %c0_4 = arith.constant 0 : index
    %2 = vector.load %arg3[%c0_3, %c0_4] : memref<1x32xf32, #tpu.memory_space<vmem>>, vector<1x32xf32>
    %cst = arith.constant dense<0.000000e+00> : vector<8xf32>
    %3 = vector.multi_reduction <add>, %0, %cst [1] : vector<8x32xf32> to vector<8xf32>
    %4 = vector.shape_cast %3 : vector<8xf32> to vector<8x1xf32>
    %cst_5 = arith.constant 3.200000e+01 : f32
    %5 = vector.broadcast %cst_5 : f32 to vector<8x1xf32>
    %6 = arith.divf %4, %5 : vector<8x1xf32>
    %7 = vector.broadcast %6 : vector<8x1xf32> to vector<8x32xf32>
    %8 = arith.subf %0, %7 : vector<8x32xf32>
    %9 = arith.mulf %8, %8 : vector<8x32xf32>
    %cst_6 = arith.constant dense<0.000000e+00> : vector<8xf32>
    %10 = vector.multi_reduction <add>, %9, %cst_6 [1] : vector<8x32xf32> to vector<8xf32>
    %11 = vector.shape_cast %10 : vector<8xf32> to vector<8x1xf32>
    %cst_7 = arith.constant 3.200000e+01 : f32
    %12 = vector.broadcast %cst_7 : f32 to vector<8x1xf32>
    %13 = arith.divf %11, %12 : vector<8x1xf32>
    %cst_8 = arith.constant 9.99999996E-13 : f32
    %14 = vector.broadcast %cst_8 : f32 to vector<8x1xf32>
    %15 = arith.addf %13, %14 : vector<8x1xf32>
    %16 = math.rsqrt %15 : vector<8x1xf32>
    %17 = vector.broadcast %16 : vector<8x1xf32> to vector<8x32xf32>
    %18 = arith.mulf %8, %17 : vector<8x32xf32>
    %19 = vector.broadcast %1 : vector<1x32xf32> to vector<8x32xf32>
    %20 = arith.mulf %18, %19 : vector<8x32xf32>
    %21 = vector.broadcast %2 : vector<1x32xf32> to vector<8x32xf32>
    %22 = arith.addf %20, %21 : vector<8x32xf32>
    %c0_9 = arith.constant 0 : index
    %c0_10 = arith.constant 0 : index
    %23 = vector.load %arg4[%c0_9, %c0_10] : memref<8x32xf32, #tpu.memory_space<vmem>>, vector<8x32xf32>
    tpu.vector_store %arg4[%c0_9, %c0_10], %22 {strides = array<i32>} : memref<8x32xf32, #tpu.memory_space<vmem>>, vector<8x32xf32>,
    return
  }
  func.func @transform_0(%arg0: i32) -> (i32, i32) {
    %c0_i32 = arith.constant 0 : i32
    %c0_i32_0 = arith.constant 0 : i32
    return %arg0, %c0_i32 : i32, i32
  }
  func.func @transform_1(%arg0: i32) -> (i32, i32) {
    %c0_i32 = arith.constant 0 : i32
    %c0_i32_0 = arith.constant 0 : i32
    %c0_i32_1 = arith.constant 0 : i32
    return %c0_i32, %c0_i32_0 : i32, i32
  }
  func.func @transform_2(%arg0: i32) -> (i32, i32) {
    %c0_i32 = arith.constant 0 : i32
    %c0_i32_0 = arith.constant 0 : i32
    %c0_i32_1 = arith.constant 0 : i32
    return %c0_i32, %c0_i32_0 : i32, i32
  }
  func.func @transform_3(%arg0: i32) -> (i32, i32) {
    %c0_i32 = arith.constant 0 : i32
    %c0_i32_0 = arith.constant 0 : i32
    return %arg0, %c0_i32 : i32, i32
  }
}

</mosaic_0001>

<bundles_post_ra>
// kernel: tpu_custom_call.1
= control target key start
LH: loop header
LB: loop body
LE: loop exit
PB: predicated region body
PF: predicated region fallthrough
CT: control target
= control target key end

     0   :  { %8 = vsyncpa [#allocation3], 0  ;;  %s631_s0 = inlined_call_operand.hbm [shape: f32[16,32], index: 0, kind: input, shape index: {}]   ;;  %s632_s1 = inlined_call_operand.vmem [shape: f32[1,32], index: 1, kind: input, shape index: {}]   ;;  %s633_s2 = inlined_call_operand.vmem [shape: f32[1,32], index: 2, kind: input, shape index: {}]   ;;  %s634_s3 = inlined_call_operand.hbm [shape: f32[16,32], index: 3, kind: output, shape index: {}]  }
   0x1   :  { %10 = vsyncpa [#allocation3 + $0x1], 0 }
   0x2   :  { %11 = vsyncpa [#allocation4], 0 }
   0x3   :  { %13 = vsyncpa [#allocation4 + $0x1], 0  ;;  %s481_s12 = smov 0   ;;  %s483_s13 = smov 0  }
   0x4   :  { %s485_s14 = smov 0   ;;  %s487_s15 = smov 0  }
   0x5 LB: > { %s502_s16 = sadd.s32 4294967295, %s457_s15   ;;  %s303_s17 = sadd.s32 4294967294, %s457_s15   ;;  %s457_s15 = sphi %s487_s15, %s651_s15   ;;  %s453_s14 = sphi %s485_s14, %s650_s14   ;;  %s449_s13 = sphi %s483_s13, %s649_s13   ;;  %s445_s12 = sphi %s481_s12, %s648_s12  }
   0x6   : > { %s506_s18 = sadd.s32 1, %s457_s15   ;;  %s26_s19 = sadd.s32 1, %s453_s14 }
   0x7   : > { %s23_s20 = ssub.s32 %s457_s15, %s506_s18  ;;  %p33_p0 = scmp.ne.s32.totalorder %s453_s14, %s449_s13 }
   0x8   : > { %p24_p1 = scmp.eq.s32.totalorder %s23_s20, 0  ;;  %p34_p2 = scmp.eq.s32.totalorder %s457_s15, 0 }
   0x9   : > { %p39_p3 = scmp.ne.s32.totalorder %s449_s13, %s445_s12  ;;  %p40_p4 = scmp.eq.s32.totalorder %s502_s16, 0 }
   0xa   : > { %s518_s21 = scalar_select %p24_p1, %s453_s14, %s26_s19  }
   0xb   : > { %p520_p5 = por %p34_p2, %p33_p0  ;;  %p524_p6 = por %p40_p4, %p39_p3 }
   0xc   : > { %p105_p7 = scmp.eq.s32.totalorder %s502_s16, 1  ;;  %p111_p8 = scmp.eq.s32.totalorder %s303_s17, 1 }
   0xd   : > { %s638_s23 = scalar_select %p524_p6, 1, 0 }
   0xe   : > { %p329_p10 = scmp.lt.s32.totalorder %s457_s15, 2  ;;  %p531_p11 = por %p105_p7, %p33_p0 }
   0xf   : > { %p535_p12 = por %p111_p8, %p39_p3  ;;  %s137_s26 = sand.u32 1, %s453_s14  }
  0x10   : > { %s639_s24 = scalar_select %p531_p11, 1, 0 }
  0x11   : > { %s640_s25 = scalar_select %p535_p12, 1, 0 }
  0x12   : > { %s307_s27 = sshll.u32 %s457_s15, 7  ;;  %s306_s28 = sshll.u32 %s137_s26, 3 }
  0x13   : > { %s544_s4 = scalar_lea.hbm %s631_s0, %s307_s27  ;;  %s141_s5 = scalar_lea.vmem [#allocation2], %s306_s28 }
  0x14   : > { %s148_s6 = sshll.u32 %s141_s5, 4  ;;  %p548_p13 = pnand %p329_p10, %p520_p5  ;;  %s552_s6 = int_to_ptr.vmem [resolvable:$true] %s148_s6 }
  0x15   : > { %s138_s8 = scalar_lea.sflag [#allocation3], %s137_s26  ;;  %s365_s9 = scalar_lea.hbm %s544_s4, 128 }
  0x16   : > { %p366_p2 = scmp.ne.s32.totalorder %s544_s4, %s365_s9  ;;  %p367_p3 = pneg %p548_p13 }
  0x17   : > { %s370_s17 = scalar_lea.hbm %s631_s0, 256  ;;  %p371_p5 = scmp.lt.s32.totalorder %s544_s4, %s631_s0 }
  0x18   : > { %p368_p4 = pnand %p367_p3, %p366_p2  ;;  %p372_p8 = scmp.lt.s32.totalorder %s370_s17, %s365_s9 }
  0x1a   : > { %p369_p7 = pneg %p368_p4  ;;  %p373_p10 = por %p372_p8, %p371_p5 }
  0x1c   : > { %p374_p9 = pnand %p373_p10, %p369_p7 }
  0x1e   : > { %377 = shalt.err (!%p374_p9)
}
  0x1f   : > { %s378_s22 = scalar_lea.vmem %s552_s6, 128  ;;  %s459_s26 = smov [#allocation2]  }
  0x20   : > { %p379_p0 = scmp.ne.s32.totalorder %s552_s6, %s378_s22  ;;  %s383_s27 = sshll.u32 %s459_s26, 4  ;;  %s384_s27 = int_to_ptr.vmem [resolvable:$false] %s383_s27 }
  0x21   : > { %s385_s28 = scalar_lea.vmem %s384_s27, 256  ;;  %p386_p4 = scmp.lt.s32.totalorder %s552_s6, %s384_s27 }
  0x22   : > { %p381_p1 = pnand %p379_p0, %p367_p3  ;;  %p387_p12 = scmp.lt.s32.totalorder %s385_s28, %s378_s22 }
  0x24   : > { %p382_p2 = pneg %p381_p1  ;;  %p388_p11 = por %p387_p12, %p386_p4 }
  0x26   : > { %p389_p6 = pnand %p388_p11, %p382_p2 }
  0x28   : > { %392 = shalt.err (!%p389_p6)
}
  0x29   : > { %324 = dma.hbm_to_vmem [thread:$0]  (!%p548_p13), %s544_s4, 128, %s552_s6, %s138_s8  }
  0x2a   : > { %p642_p9 = scmp.lt.s32.totalorder %s457_s15, 3  ;;  %p643_p7 = scmp.ge.s32.totalorder %s457_s15, 1 }
  0x2c   : > { %p154_p0 = pnand %p643_p7, %p642_p9 }
  0x2d   : > { %s579_s29 = sand.u32 (!%p154_p0), 1, %s449_s13   ;;  %p644_p6 = scmp.ne.s32.totalorder (!%p154_p0), %s638_s23, 0 }
  0x2e   : > { %157 = sbr.rel (%p154_p0) target bundleno = 374 (0x176), region = 32  ;;  %s309_s30 = sshll.u32 (!%p154_p0), %s579_s29, 3 }
  0x2f   : > { %s160_s5 = scalar_lea.sflag (!%p154_p0), [#allocation3], %s579_s29  ;;  %s163_s9 = scalar_lea.vmem (!%p154_p0), [#allocation2], %s309_s30 }
  0x33   : > { %436 = dma.done.wait (%p644_p6), %s160_s5, 128  }
  0x34   : > { %438 = vsyncadd (%p644_p6), %s160_s5, 4294967168  ;;  %vm189_vm0 = vcmask 261120   ;;  %v186_v0 = vld [vmem:[%s163_s9] sm:$0xff]  ;;  %s314_s8 = sshll.u32 %s502_s16, 7  ;;  %s185_s10 = scalar_lea.vmem [#allocation5], %s309_s30 }
  0x35   : > { %v190_v1 = vsel %vm189_vm0, %v186_v0, 0.0  ;;  %v311_v11 = vld [vmem:[%s632_s1] ss:$0 sm:$0xff]  ;;  %s233_s11 = sshll.u32 %s185_s10, 4  ;;  %s231_s20 = scalar_lea.hbm %s634_s3, %s314_s8  ;;  %s234_s11 = int_to_ptr.vmem [resolvable:$true] %s233_s11 }
  0x36   : > { %191 = vadd.xlane.f32.xlu0 %v190_v1  ;;  %v312_v13 = vld [vmem:[%s633_s2] ss:$0 sm:$0xff]  ;;  %s220_s22 = scalar_lea.sflag [#allocation4], %s579_s29  ;;  %s393_s26 = scalar_lea.vmem %s234_s11, 128 }
  0x37   : > { %p394_p11 = scmp.ne.s32.totalorder %s234_s11, %s393_s26  ;;  %p645_p12 = scmp.ne.s32.totalorder %s639_s24, 0 }
  0x38   : > { %s460_s27 = smov [#allocation5]  }
  0x39   : > { %p395_p13 = pnand %p394_p11, %p645_p12  ;;  %s397_s28 = sshll.u32 %s460_s27, 4  ;;  %s398_s28 = int_to_ptr.vmem [resolvable:$false] %s397_s28 }
  0x3a   : > { %s399_s16 = scalar_lea.vmem %s398_s28, 256  ;;  %p400_p3 = scmp.lt.s32.totalorder %s234_s11, %s398_s28 }
  0x3b   : > { %p396_p1 = pneg %p395_p13  ;;  %p401_p5 = scmp.lt.s32.totalorder %s399_s16, %s393_s26 }
  0x3d   : > { %p402_p8 = por %p401_p5, %p400_p3 }
  0x3f   : > { %p403_p10 = pnand %p402_p8, %p396_p1 }
  0xbf   : > { %v192_v2 = vpop.xlane.xlu0 %191 }
  0xc0   : > { %v194_v3 = vmul.f32 0.03125, %v192_v2 }
  0xc2   : > { %v195_v4 = vsub.f32 %v186_v0, %v194_v3 }
  0xc4   : > { %v196_v5 = vmul.f32 %v195_v4, %v195_v4 }
  0xc6   : > { %v197_v6 = vsel %vm189_vm0, %v196_v5, 0.0 }
  0xc7   : > { %198 = vadd.xlane.f32.xlu0 %v197_v6 }
 0x150   : > { %v199_v7 = vpop.xlane.xlu0 %198 }
 0x151   : > { %v200_v8 = vmul.f32 0.03125, %v199_v7 }
 0x153   : > { %v201_v9 = vadd.f32 1e-12, %v200_v8 }
 0x155   : > { %363 = vrsqrt.f32 %v201_v9 }
 0x162   : > { %v364_v10 = vpop.eup %363 }
 0x163   : > { %v203_v12 = vmul.f32 %v364_v10, %v195_v4 }
 0x165   : > { %v210_v14 = vmul.f32 %v311_v11, %v203_v12 }
 0x167   : > { %v217_v15 = vadd.f32 %v312_v13, %v210_v14 }
 0x169   : > { %218 = vst.msk [vmem:[%s185_s10] sm:$0xff] %vm189_vm0, %v217_v15 }
 0x16a   : > { %406 = shalt.err (!%p403_p10)
}
 0x16b   : > { %s407_s30 = scalar_lea.hbm %s231_s20, 128  ;;  %s411_s9 = scalar_lea.hbm %s634_s3, 256 }
 0x16c   : > { %p408_p2 = scmp.ne.s32.totalorder %s231_s20, %s407_s30  ;;  %p412_p7 = scmp.lt.s32.totalorder %s231_s20, %s634_s3 }
 0x16d   : > { %p413_p0 = scmp.lt.s32.totalorder %s411_s9, %s407_s30 }
 0x16e   : > { %p409_p4 = pnand %p408_p2, %p645_p12 }
 0x16f   : > { %p414_p6 = por %p413_p0, %p412_p7 }
 0x170   : > { %p410_p9 = pneg %p409_p4 }
 0x172   : > { %p415_p11 = pnand %p414_p6, %p410_p9 }
 0x174   : > { %418 = shalt.err (!%p415_p11)
}
 0x175   : > { %319 = dma.vmem_to_hbm [thread:$0]  (%p645_p12), %s234_s11, 128, %s231_s20, %s220_s22  }
 0x176 PF: > { %s245_s6 = sand.u32 1, %s445_s12   ;;  %p646_p13 = scmp.ne.s32.totalorder %s640_s25, 0 }
 0x177   : > { %p647_p1 = scmp.ge.s32.totalorder %s457_s15, 2  ;;  %s246_s7 = scalar_lea.sflag [#allocation4], %s245_s6 }
 0x179   : > { %p326_p3 = pnand %p647_p1, %p646_p13 }
 0x17b   : > { %p327_p5 = pneg %p326_p3 }
 0x17d   : > { %440 = dma.done.wait (%p327_p5), %s246_s7, 128  }
 0x17e   : > { %442 = vsyncadd (%p327_p5), %s246_s7, 4294967168  ;;  %p16_p8 = scmp.ge.s32.totalorder %s506_s18, 4   ;;  %s648_s12 = smov %s449_s13 }
 0x17f   : > { %s649_s13 = smov %s453_s14  ;;  %s650_s14 = smov %s518_s21 }
 0x180   : > { %s651_s15 = smov %s506_s18  ;;  %18 = sbr.rel (!%p16_p8) target bundleno = 5 (0x5), region = 77 }
 0x185   :  { %251 = vsyncpa [#allocation3], 1 }
 0x186   :  { %253 = vsyncpa [#allocation3 + $0x1], 1 }
 0x187   :  { %254 = vsyncpa [#allocation4], 1 }
 0x188   :  { %256 = vsyncpa [#allocation4 + $0x1], 1 }

</bundles_post_ra>
